<compile_context>
chip_gen: v7x
topology: tpu7x:2x2x1
jax: 0.10.0
libtpu: 0.0.40
codegen_flags: <defaults>
</compile_context>

<pallas_src>
import jax
import jax.numpy as jnp
from jax.experimental import pallas as pl
from jax.experimental.pallas import tpu as pltpu


HIDDEN = 40      # real hidden width of the PyTorch model
H_PAD = 48       # hidden padded to a sublane multiple (8); row HIDDEN is the ones row
TILE_B = 8192    # batch lanes per grid step (amortizes ~600-cycle step overhead)


def sine_mlp_kernel(x_ref, w1_ref, b1_ref, w2t_ref, w3_ref, b3_ref, o_ref):
    # x_ref:   (1, TB)          batch on lanes
    # w1_ref:  (H_PAD, 1)       layer-1 weight column (row HIDDEN.. = 0)
    # b1_ref:  (H_PAD, 1)       layer-1 bias column (row HIDDEN = 1 -> ones row)
    # w2t_ref: (H_PAD, H_PAD)   layer-2 weight transposed; column HIDDEN = b2
    # w3_ref:  (1, H_PAD)       layer-3 weight row
    # b3_ref:  (1, 1)
    hi = jax.lax.Precision.HIGHEST
    x = x_ref[...]                                            # (1, TB)

    # Layer 1: Linear(1, 40) + ReLU as a VPU outer-product (no K=1 MXU matmul).
    # Padded row HIDDEN becomes relu(0*x + 1) == 1, the ones row that folds the
    # layer-2 bias into the matmul below.
    h1 = jnp.maximum(w1_ref[...] * x + b1_ref[...], 0.0)      # (H_PAD, TB)

    # Layer 2: Linear(40, 40) (+ bias via ones row) + ReLU on the MXU.
    h2 = jnp.dot(w2t_ref[...], h1,
                 preferred_element_type=jnp.float32, precision=hi)
    h2 = jnp.maximum(h2, 0.0)                                 # (H_PAD, TB)

    # Layer 3: Linear(40, 1) as a (1, H_PAD) x (H_PAD, TB) MXU matmul
    # (keeps the VALU slot free); result is a lane-dense (1, TB) row.
    out = jnp.dot(w3_ref[...], h2,
                  preferred_element_type=jnp.float32, precision=hi) + b3_ref[...]
    o_ref[...] = out.astype(o_ref.dtype)                      # (1, TB)


def _pack_params(params):
    """Pad/transpose (in, out)-layout params into the kernel's column layout."""
    f32 = jnp.float32
    w1, b1 = params["w1"], params["b1"]          # (1, 40), (1, 40)
    w2, b2 = params["w2"], params["b2"]          # (40, 40), (1, 40)
    w3, b3 = params["w3"], params["b3"]          # (40, 1), (1, 1)

    w1c = jnp.zeros((H_PAD, 1), f32).at[:HIDDEN, 0].set(w1[0, :].astype(f32))
    b1c = jnp.zeros((H_PAD, 1), f32).at[:HIDDEN, 0].set(b1[0, :].astype(f32))
    b1c = b1c.at[HIDDEN, 0].set(1.0)             # ones row for layer-2 bias fold

    w2t = jnp.zeros((H_PAD, H_PAD), f32)
    w2t = w2t.at[:HIDDEN, :HIDDEN].set(w2.T.astype(f32))
    w2t = w2t.at[:HIDDEN, HIDDEN].set(b2[0, :].astype(f32))   # bias column

    w3r = jnp.zeros((1, H_PAD), f32).at[0, :HIDDEN].set(w3[:, 0].astype(f32))
    b3s = b3.reshape(1, 1).astype(f32)
    return w1c, b1c, w2t, w3r, b3s


def sine_network_forward(x, params, *, tile_b=TILE_B):
    """x: (B, 1) float32.  params: dict with (in, out)-layout w1,b1,w2,b2,w3,b3."""
    B, in_dim = x.shape
    out_dim = params["w3"].shape[1]
    if in_dim != 1 or out_dim != 1:
        # TODO(synk): generalize the VPU layer-1 / MXU layer-3 paths to in/out dims > 1.
        raise NotImplementedError("kernel specialized for in_dim == out_dim == 1")

    w1c, b1c, w2t, w3r, b3s = _pack_params(params)

    # Lane-dense batch row: (B, 1) -> (1, B) is a free row-major reshape; only
    # the ragged remainder of the last tile gets zero-padded (no full-batch
    # rewrite in HBM).
    tb = min(tile_b, pl.cdiv(B, 128) * 128)
    n_tiles = pl.cdiv(B, tb)
    b_pad = n_tiles * tb
    x_row = x.astype(jnp.float32).reshape(1, B)
    if b_pad != B:
        x_row = jnp.pad(x_row, ((0, 0), (0, b_pad - B)))

    # VMEM budget: h1/h2 intermediates + double-buffered x/out blocks + weights.
    vmem_need = (2 * H_PAD * tb * 4
                 + 2 * 2 * tb * 4
                 + 4 * (H_PAD * H_PAD + 3 * H_PAD + 1))
    vmem_limit = int(min(max(2 * vmem_need + (2 << 20), 16 << 20), 32 << 20))

    cost = pl.CostEstimate(
        flops=int(b_pad * (2 * H_PAD * H_PAD + 8 * H_PAD + 2)),
        transcendentals=0,
        bytes_accessed=int(8 * b_pad + 4 * (H_PAD * H_PAD + 3 * H_PAD + 1)),
    )

    const = lambda i: (0, 0)  # weights/biases: resident in VMEM across grid steps
    out_row = pl.pallas_call(
        sine_mlp_kernel,
        out_shape=jax.ShapeDtypeStruct((1, b_pad), jnp.float32),
        grid=(n_tiles,),
        in_specs=[
            pl.BlockSpec((1, tb), lambda i: (0, i)),          # x
            pl.BlockSpec((H_PAD, 1), const),                  # w1 column
            pl.BlockSpec((H_PAD, 1), const),                  # b1 column (+ ones row)
            pl.BlockSpec((H_PAD, H_PAD), const),              # w2^T (+ bias column)
            pl.BlockSpec((1, H_PAD), const),                  # w3 row
            pl.BlockSpec((1, 1), const),                      # b3 scalar
        ],
        out_specs=pl.BlockSpec((1, tb), lambda i: (0, i)),
        compiler_params=pltpu.CompilerParams(
            dimension_semantics=("parallel",),
            vmem_limit_bytes=vmem_limit),
        cost_estimate=cost,
    )(x_row, w1c, b1c, w2t, w3r, b3s)

    return out_row[0, :B].reshape(B, out_dim)


def init_params(key, in_dim=1, out_dim=1):
    """nn.Linear default weight init (U(-sqrt(k), sqrt(k)), k=1/fan_in) with
    zero_bias=True, weights stored transposed vs. PyTorch, i.e. (in, out)."""
    k1, k2, k3 = jax.random.split(key, 3)

    def uniform_w(k, fan_in, fan_out):
        bound = 1.0 / jnp.sqrt(jnp.float32(fan_in))
        return jax.random.uniform(k, (fan_in, fan_out), jnp.float32,
                                  minval=-bound, maxval=bound)

    return {
        "w1": uniform_w(k1, in_dim, HIDDEN),
        "b1": jnp.zeros((1, HIDDEN), jnp.float32),
        "w2": uniform_w(k2, HIDDEN, HIDDEN),
        "b2": jnp.zeros((1, HIDDEN), jnp.float32),
        "w3": uniform_w(k3, HIDDEN, out_dim),
        "b3": jnp.zeros((1, out_dim), jnp.float32),
    }


def reference_forward(x, p):
    hi = jax.lax.Precision.HIGHEST
    h1 = jnp.maximum(jnp.dot(x, p["w1"], precision=hi) + p["b1"], 0.0)
    h2 = jnp.maximum(jnp.dot(h1, p["w2"], precision=hi) + p["b2"], 0.0)
    return jnp.dot(h2, p["w3"], precision=hi) + p["b3"]


if __name__ == "__main__":
    key = jax.random.PRNGKey(0)
    kx, kp = jax.random.split(key)

    B, in_dim, out_dim = 8, 1, 1
    x = jax.random.uniform(kx, (B, in_dim), jnp.float32, minval=-5.0, maxval=5.0)
    params = init_params(kp, in_dim=in_dim, out_dim=out_dim)

    out = sine_network_forward(x, params)
    out = jax.block_until_ready(out)

    ref = reference_forward(x, params)
    assert out.shape == (B, out_dim)
    assert jnp.allclose(out, ref, atol=2e-3, rtol=2e-3), "mismatch vs reference"

    print("KERNEL_OK")
</pallas_src>

<mosaic_0001>
module attributes {stable_mosaic.version = 11 : i64} {
  func.func @sine_mlp_kernel(%arg0: i32, %arg1: memref<1x128xf32, #tpu.memory_space<vmem>>, %arg2: memref<48x1xf32, #tpu.memory_space<vmem>>, %arg3: memref<48x1xf32, #tpu.memory_space<vmem>>, %arg4: memref<48x48xf32, #tpu.memory_space<vmem>>, %arg5: memref<1x48xf32, #tpu.memory_space<vmem>>, %arg6: memref<1x1xf32, #tpu.memory_space<vmem>>, %arg7: memref<1x128xf32, #tpu.memory_space<vmem>>) attributes {dimension_semantics = [#tpu.dimension_semantics<parallel>], iteration_bounds = array<i64: 1>, scalar_prefetch = 0 : i64, scratch_operands = 0 : i64, tpu.core_type = #tpu.core_type<tc>, window_params = [{transform_indices = @transform_0, window_bounds = array<i64: 1, 128>}, {pipeline_mode = #tpu.pipeline_mode<synchronous>, transform_indices = @transform_1, window_bounds = array<i64: 48, 1>}, {pipeline_mode = #tpu.pipeline_mode<synchronous>, transform_indices = @transform_2, window_bounds = array<i64: 48, 1>}, {pipeline_mode = #tpu.pipeline_mode<synchronous>, transform_indices = @transform_3, window_bounds = array<i64: 48, 48>}, {pipeline_mode = #tpu.pipeline_mode<synchronous>, transform_indices = @transform_4, window_bounds = array<i64: 1, 48>}, {pipeline_mode = #tpu.pipeline_mode<synchronous>, transform_indices = @transform_5, window_bounds = array<i64: 1, 1>}, {transform_indices = @transform_6, window_bounds = array<i64: 1, 128>}]} {
    %c0 = arith.constant 0 : index
    %c0_0 = arith.constant 0 : index
    %0 = vector.load %arg1[%c0, %c0_0] : memref<1x128xf32, #tpu.memory_space<vmem>>, vector<1x128xf32>
    %c0_1 = arith.constant 0 : index
    %c0_2 = arith.constant 0 : index
    %1 = vector.load %arg2[%c0_1, %c0_2] : memref<48x1xf32, #tpu.memory_space<vmem>>, vector<48x1xf32>
    %2 = vector.broadcast %1 : vector<48x1xf32> to vector<48x128xf32>
    %3 = vector.broadcast %0 : vector<1x128xf32> to vector<48x128xf32>
    %4 = arith.mulf %2, %3 : vector<48x128xf32>
    %c0_3 = arith.constant 0 : index
    %c0_4 = arith.constant 0 : index
    %5 = vector.load %arg3[%c0_3, %c0_4] : memref<48x1xf32, #tpu.memory_space<vmem>>, vector<48x1xf32>
    %6 = vector.broadcast %5 : vector<48x1xf32> to vector<48x128xf32>
    %7 = arith.addf %4, %6 : vector<48x128xf32>
    %cst = arith.constant 0.000000e+00 : f32
    %8 = vector.broadcast %cst : f32 to vector<48x128xf32>
    %9 = arith.maximumf %7, %8 : vector<48x128xf32>
    %c0_5 = arith.constant 0 : index
    %c0_6 = arith.constant 0 : index
    %10 = vector.load %arg4[%c0_5, %c0_6] : memref<48x48xf32, #tpu.memory_space<vmem>>, vector<48x48xf32>
    %cst_7 = arith.constant dense<0.000000e+00> : vector<48x128xf32>
    %11 = tpu.matmul %10, %9, %cst_7 {dimension_numbers = #tpu.dot_dimension_numbers<[1], [0], [0], [1], [0, 0, 1, 1], [], []>, precision = #tpu.contract_precision<fp32>} : vector<48x48xf32>, vector<48x128xf32>, vector<48x128xf32> -> vector<48x128xf32>
    %cst_8 = arith.constant 0.000000e+00 : f32
    %12 = vector.broadcast %cst_8 : f32 to vector<48x128xf32>
    %13 = arith.maximumf %11, %12 : vector<48x128xf32>
    %c0_9 = arith.constant 0 : index
    %c0_10 = arith.constant 0 : index
    %14 = vector.load %arg5[%c0_9, %c0_10] : memref<1x48xf32, #tpu.memory_space<vmem>>, vector<1x48xf32>
    %cst_11 = arith.constant dense<0.000000e+00> : vector<1x128xf32>
    %15 = tpu.matmul %14, %13, %cst_11 {dimension_numbers = #tpu.dot_dimension_numbers<[1], [0], [0], [1], [0, 0, 1, 1], [], []>, precision = #tpu.contract_precision<fp32>} : vector<1x48xf32>, vector<48x128xf32>, vector<1x128xf32> -> vector<1x128xf32>
    %c0_12 = arith.constant 0 : index
    %c0_13 = arith.constant 0 : index
    %16 = vector.load %arg6[%c0_12, %c0_13] : memref<1x1xf32, #tpu.memory_space<vmem>>, vector<1x1xf32>
    %17 = vector.broadcast %16 : vector<1x1xf32> to vector<1x128xf32>
    %18 = arith.addf %15, %17 : vector<1x128xf32>
    %c0_14 = arith.constant 0 : index
    %c0_15 = arith.constant 0 : index
    %19 = vector.load %arg7[%c0_14, %c0_15] : memref<1x128xf32, #tpu.memory_space<vmem>>, vector<1x128xf32>
    tpu.vector_store %arg7[%c0_14, %c0_15], %18 {strides = array<i32>} : memref<1x128xf32, #tpu.memory_space<vmem>>, vector<1x128xf32>,
    return
  }
  func.func @transform_0(%arg0: i32) -> (i32, i32) {
    %c0_i32 = arith.constant 0 : i32
    %c0_i32_0 = arith.constant 0 : i32
    return %c0_i32, %arg0 : i32, i32
  }
  func.func @transform_1(%arg0: i32) -> (i32, i32) {
    %c0_i32 = arith.constant 0 : i32
    %c0_i32_0 = arith.constant 0 : i32
    %c0_i32_1 = arith.constant 0 : i32
    return %c0_i32, %c0_i32_0 : i32, i32
  }
  func.func @transform_2(%arg0: i32) -> (i32, i32) {
    %c0_i32 = arith.constant 0 : i32
    %c0_i32_0 = arith.constant 0 : i32
    %c0_i32_1 = arith.constant 0 : i32
    return %c0_i32, %c0_i32_0 : i32, i32
  }
  func.func @transform_3(%arg0: i32) -> (i32, i32) {
    %c0_i32 = arith.constant 0 : i32
    %c0_i32_0 = arith.constant 0 : i32
    %c0_i32_1 = arith.constant 0 : i32
    return %c0_i32, %c0_i32_0 : i32, i32
  }
  func.func @transform_4(%arg0: i32) -> (i32, i32) {
    %c0_i32 = arith.constant 0 : i32
    %c0_i32_0 = arith.constant 0 : i32
    %c0_i32_1 = arith.constant 0 : i32
    return %c0_i32, %c0_i32_0 : i32, i32
  }
  func.func @transform_5(%arg0: i32) -> (i32, i32) {
    %c0_i32 = arith.constant 0 : i32
    %c0_i32_0 = arith.constant 0 : i32
    %c0_i32_1 = arith.constant 0 : i32
    return %c0_i32, %c0_i32_0 : i32, i32
  }
  func.func @transform_6(%arg0: i32) -> (i32, i32) {
    %c0_i32 = arith.constant 0 : i32
    %c0_i32_0 = arith.constant 0 : i32
    return %c0_i32, %arg0 : i32, i32
  }
}

</mosaic_0001>

<bundles_post_ra>
// kernel: tpu_custom_call.1
= control target key start
LH: loop header
LB: loop body
LE: loop exit
PB: predicated region body
PF: predicated region fallthrough
CT: control target
= control target key end

     0   :  { %s2299_s0 = inlined_call_operand.vmem [shape: f32[1,128], index: 0, kind: input, shape index: {}]   ;;  %s2300_s1 = inlined_call_operand.vmem [shape: f32[48,1], index: 1, kind: input, shape index: {}]   ;;  %s2301_s2 = inlined_call_operand.vmem [shape: f32[48,1], index: 2, kind: input, shape index: {}]   ;;  %s2302_s3 = inlined_call_operand.vmem [shape: f32[48,48], index: 3, kind: input, shape index: {}]   ;;  %s2303_s4 = inlined_call_operand.vmem [shape: f32[1,48], index: 4, kind: input, shape index: {}]   ;;  %s2304_s5 = inlined_call_operand.<no memory space> [shape: f32[1,1], index: 5, kind: input, shape index: {}]   ;;  %s2305_s6 = inlined_call_operand.hbm [shape: f32[1,128], index: 6, kind: output, shape index: {}]  }
   0x1   :  { %v11_v0 = vstv %s2304_s5 }
   0x2   :  { %12 = vst [vmem:[#allocation2] sm:$0x1] %v11_v0 }
   0x3   :  { %v75_v1 = vld [vmem:[%s2301_s2] sm:$0xff]  ;;  %v1949_v3 = vmov 0   ;;  %v76_v4 = vld [vmem:[%s2301_s2 + $0x8] sm:$0xff] }
   0x4   :  { %v27_v2 = vld [vmem:[%s2300_s1] sm:$0xff]  ;;  %1924 = vset.pattern.permute.xlu1 %v1949_v3  ;;  %1923 = vset.pattern.permute.xlu0 %v1949_v3  ;;  %v28_v5 = vld [vmem:[%s2300_s1 + $0x8] sm:$0xff] }
   0x5   :  { %83 = vperm.xlu1 %1924, %v75_v1   ;;  %35 = vperm.xlu0 %1923, %v27_v2  }
   0x6   :  { %13 = vsyncpa [#allocation4], 0  ;;  %v30_v6 = vld [vmem:[%s2300_s1 + $0x18] sm:$0xff]  ;;  %v29_v7 = vld [vmem:[%s2300_s1 + $0x10] sm:$0xff]  ;;  %vm129_vm0 = vcmask 392192   ;;  %vm1951_vm1 = vmmov 0  }
   0x7   :  { %v78_v8 = vld [vmem:[%s2301_s2 + $0x18] sm:$0xff]  ;;  %v77_v9 = vld [vmem:[%s2301_s2 + $0x10] sm:$0xff]  ;;  %v32_v10 = vld [vmem:[%s2300_s1 + $0x28] sm:$0xff] }
   0x8   :  { %v31_v11 = vld [vmem:[%s2300_s1 + $0x20] sm:$0xff]  ;;  %v80_v12 = vld [vmem:[%s2301_s2 + $0x28] sm:$0xff]  ;;  %v125_v35 = vld [vmem:[%s2302_s3 + $0x10] sm:$0xff] }
   0x9   :  { %88 = vperm.xlu1 %1924, %v76_v4   ;;  %40 = vperm.xlu0 %1923, %v28_v5   ;;  %v79_v13 = vld [vmem:[%s2301_s2 + $0x20] sm:$0xff]  ;;  %v124_v31 = vld [vmem:[%s2302_s3 + $0x8] sm:$0xff]  ;;  %v126_v38 = vld [vmem:[%s2302_s3 + $0x18] sm:$0xff]  ;;  %v137_v43 = vsel %vm129_vm0, %v125_v35, 0 }
   0xa   :  { %v123_v14 = vld [vmem:[%s2302_s3] sm:$0xff]  ;;  %v134_v37 = vsel %vm129_vm0, %v124_v31, 0  ;;  %v140_v47 = vsel %vm129_vm0, %v126_v38, 0  ;;  %v2067_v54 = vand.u32 4294901760, %v137_v43  ;;  %v128_v55 = vld [vmem:[%s2302_s3 + $0x28] sm:$0xff] }
   0xb   :  { %v881_v15 = vld [vmem:[#allocation2] sm:$0x1]  ;;  %v131_v16 = vsel %vm129_vm0, %v123_v14, 0  ;;  %v2055_v46 = vand.u32 4294901760, %v134_v37  ;;  %v2079_v63 = vand.u32 4294901760, %v140_v47  ;;  %v146_v2 = vsel %vm129_vm0, %v128_v55, 0 }
   0xc   :  { %v2032_v17 = vand.u32 4294901760, %v131_v16  ;;  %v1420_v22 = vld [vmem:[%s2299_s0] ss:$0 sm:$0xff]  ;;  %v2084_v5 = vsub.f32 %v137_v43, %v2067_v54 }
   0xd   :  { %50 = vperm.xlu1 %1924, %v30_v6   ;;  %45 = vperm.xlu0 %1923, %v29_v7   ;;  %v127_v48 = vld [vmem:[%s2302_s3 + $0x20] sm:$0xff]  ;;  %v2077_v62 = vsub.f32 %v134_v37, %v2055_v46 }
   0xe   :  { %v2035_v18 = vsub.f32 %v131_v16, %v2032_v17  ;;  %v143_v58 = vsel %vm129_vm0, %v127_v48, 0  ;;  %v2101_v16 = vand.u32 4294901760, %v146_v2 }
   0xf   :  { %v2086_v6 = vand.u32 4294901760, %v143_v58  ;;  %v231_v14 = vand.u32 4294901760, %v2077_v62 }
  0x10   :  { %v221_v19 = vand.u32 4294901760, %v2035_v18 }
  0x11   :  { %98 = vperm.xlu1 %1924, %v78_v8   ;;  %93 = vperm.xlu0 %1923, %v77_v9  }
  0x12   :  { %v222_v20 = vsub.f32 %v2035_v18, %v221_v19 }
  0x14   :  { %v223_v21 = vand.u32 4294901760, %v222_v20 }
  0x15   :  { %60 = vperm.xlu1 %1924, %v32_v10   ;;  %55 = vperm.xlu0 %1923, %v31_v11  }
  0x16   :  { %1547 = vmatprep.mubr.f32.mxu0 %v223_v21 }
  0x19   :  { %108 = vperm.xlu1 %1924, %v80_v12   ;;  %103 = vperm.xlu0 %1923, %v79_v13  }
  0x1d   :  { %884 = vperm.xlu0 %1923, %v881_v15   ;;  %v2099_v15 = vsub.f32 %v140_v47, %v2079_v63 }
  0x1f   :  { %v251_v31 = vand.u32 4294901760, %v2099_v15 }
  0x84   :  { %v84_v23 = vpop.permute.xlu1 %83  ;;  %v36_v24 = vpop.permute.xlu0 %35 }
  0x85   :  { %v69_v25 = vmul.f32 %v1420_v22, %v36_v24 }
  0x87   :  { %v111_v26 = vadd.f32 %v84_v23, %v69_v25  ;;  %v241_v25 = vand.u32 4294901760, %v2084_v5 }
  0x88   :  { %v89_v27 = vpop.permute.xlu1 %88  ;;  %v41_v28 = vpop.permute.xlu0 %40 }
  0x89   :  { %v70_v29 = vmul.f32 %v1420_v22, %v41_v28  ;;  %v117_v30 = vmax.f32 %v111_v26, 0.0  ;;  %v2112_v26 = vsub.f32 %v143_v58, %v2086_v6  ;;  %v242_v38 = vsub.f32 %v2084_v5, %v241_v25 }
  0x8b   :  { %v112_v32 = vadd.f32 %v89_v27, %v70_v29  ;;  %v149_v39 = vand.u32 4294901760, %v117_v30 }
  0x8c   :  { %v51_v33 = vpop.permute.xlu1 %50  ;;  %v46_v34 = vpop.permute.xlu0 %45 }
  0x8d   :  { %v118_v36 = vmax.f32 %v112_v32, 0.0  ;;  %v72_v41 = vmul.f32 %v1420_v22, %v51_v33  ;;  %v71_v42 = vmul.f32 %v1420_v22, %v46_v34  ;;  %v2065_v53 = vsub.f32 %v117_v30, %v149_v39 }
  0x8e   :  { %v232_v30 = vsub.f32 %v2077_v62, %v231_v14  ;;  %v2119_v32 = vsub.f32 %v146_v2, %v2101_v16 }
  0x8f   :  { %v152_v40 = vand.u32 4294901760, %v118_v36  ;;  %v282_v4 = vand.u32 4294901760, %v2065_v53 }
  0x90   :  { %v99_v44 = vpop.permute.xlu1 %98  ;;  %v94_v45 = vpop.permute.xlu0 %93  ;;  %v271_v47 = vand.u32 4294901760, %v2119_v32 }
  0x91   :  { %v2061_v49 = vpack.c.bf16 %v152_v40, %v149_v39  ;;  %v2063_v50 = vsub.f32 %v118_v36, %v152_v40  ;;  %v114_v51 = vadd.f32 %v99_v44, %v72_v41  ;;  %v113_v52 = vadd.f32 %v94_v45, %v71_v42 }
  0x92   :  { %v261_v39 = vand.u32 4294901760, %v2112_v26  ;;  %v233_v44 = vand.u32 4294901760, %v232_v30  ;;  %v252_v45 = vsub.f32 %v2099_v15, %v251_v31 }
  0x93   :  { %v120_v56 = vmax.f32 %v114_v51, 0.0  ;;  %v119_v57 = vmax.f32 %v113_v52, 0.0  ;;  %1752 = vmatprep.subr.bf16.mxu0 %v2061_v49  ;;  %v289_v61 = vand.u32 4294901760, %v2063_v50 }
  0x94   :  { %v61_v59 = vpop.permute.xlu1 %60  ;;  %v56_v60 = vpop.permute.xlu0 %55  ;;  %1754 = vmatpush3.bf16.msra.mxu0 %v2061_v49 }
  0x95   :  { %v158_v0 = vand.u32 4294901760, %v120_v56  ;;  %v155_v1 = vand.u32 4294901760, %v119_v57  ;;  %v74_v3 = vmul.f32 %v1420_v22, %v61_v59  ;;  %v73_v10 = vmul.f32 %v1420_v22, %v56_v60 }
  0x96   :  { %v290_v13 = vsub.f32 %v2063_v50, %v289_v61  ;;  %v283_v22 = vsub.f32 %v2065_v53, %v282_v4  ;;  %v253_v60 = vand.u32 4294901760, %v252_v45 }
  0x97   :  { %v2088_v7 = vsub.f32 %v120_v56, %v158_v0  ;;  %v2090_v8 = vpack.c.bf16 %v158_v0, %v155_v1  ;;  %v2092_v9 = vsub.f32 %v119_v57, %v155_v1  ;;  %v243_v56 = vand.u32 4294901760, %v242_v38 }
  0x98   :  { %v109_v11 = vpop.permute.xlu1 %108  ;;  %v104_v12 = vpop.permute.xlu0 %103  ;;  %v291_v29 = vand.u32 4294901760, %v290_v13  ;;  %v284_v37 = vand.u32 4294901760, %v283_v22  ;;  %v262_v57 = vsub.f32 %v2112_v26, %v261_v39  ;;  %v1775_v13 = vpack.c.bf16 %v2063_v50, %v2065_v53 }
  0x99   :  { %v303_v20 = vand.u32 4294901760, %v2088_v7  ;;  %v296_v21 = vand.u32 4294901760, %v2092_v9  ;;  %v116_v23 = vadd.f32 %v109_v11, %v74_v3  ;;  %v115_v24 = vadd.f32 %v104_v12, %v73_v10  ;;  %1756 = vmatprep.subr.bf16.mxu0 %v2090_v8 }
  0x9a   :  { %1758 = vmatpush3.bf16.msra.mxu0 %v2090_v8  ;;  %v1763_v43 = vpack.c.bf16 %v291_v29, %v284_v37  ;;  %v272_v3 = vsub.f32 %v2119_v32, %v271_v47  ;;  %v263_v10 = vand.u32 4294901760, %v262_v57  ;;  %v1799_v22 = vpack.c.bf16 %v289_v61, %v282_v4 }
  0x9b   :  { %v122_v27 = vmax.f32 %v116_v23, 0.0  ;;  %v121_v28 = vmax.f32 %v115_v24, 0.0  ;;  %v297_v35 = vsub.f32 %v2092_v9, %v296_v21  ;;  %v304_v36 = vsub.f32 %v2088_v7, %v303_v20 }
  0x9c   :  { %v273_v12 = vand.u32 4294901760, %v272_v3  ;;  %v1779_v23 = vpack.c.bf16 %v2088_v7, %v2092_v9 }
  0x9d   :  { %v164_v33 = vand.u32 4294901760, %v122_v27  ;;  %v161_v34 = vand.u32 4294901760, %v121_v28  ;;  %v298_v52 = vand.u32 4294901760, %v297_v35  ;;  %v305_v55 = vand.u32 4294901760, %v304_v36 }
  0x9f   :  { %v2131_v40 = vsub.f32 %v122_v27, %v164_v33  ;;  %v2133_v41 = vpack.c.bf16 %v164_v33, %v161_v34  ;;  %v2135_v42 = vsub.f32 %v121_v28, %v161_v34  ;;  %v1767_v0 = vpack.c.bf16 %v305_v55, %v298_v52 }
  0xa0   :  { %v1803_v27 = vpack.c.bf16 %v303_v20, %v296_v21 }
  0xa1   :  { %v317_v48 = vand.u32 4294901760, %v2131_v40  ;;  %v310_v51 = vand.u32 4294901760, %v2135_v42  ;;  %1760 = vmatprep.subr.bf16.mxu0 %v2133_v41  ;;  %v1783_v24 = vpack.c.bf16 %v2131_v40, %v2135_v42 }
  0xa2   :  { %1762 = vmatpush3.bf16.msra.mxu0 %v2133_v41 }
  0xa3   :  { %1764 = vmatprep.subr.bf16.mxu0 %v1763_v43  ;;  %v311_v58 = vsub.f32 %v2135_v42, %v310_v51  ;;  %v318_v59 = vsub.f32 %v2131_v40, %v317_v48 }
  0xa5   :  { %1548 = vmatmul.mubr.f32.vlgmr.msra.gmra.mrb[0].mxu0 %v233_v44  ;;  %v312_v1 = vand.u32 4294901760, %v311_v58  ;;  %v319_v2 = vand.u32 4294901760, %v318_v59 }
  0xa6   :  { %1766 = vmatpush3.bf16.msra.mxu0 %v1763_v43  ;;  %1550 = vmatprep.mubr.f32.mxu0 %v243_v56 }
  0xa7   :  { %1768 = vmatprep.subr.bf16.mxu0 %v1767_v0  ;;  %v1771_v11 = vpack.c.bf16 %v319_v2, %v312_v1 }
  0xa9   :  { %1551 = vmatmul.mubr.f32.gmra.mrb[2].mxu0 %v253_v60 }
  0xaa   :  { %1770 = vmatpush3.bf16.msra.mxu0 %v1767_v0  ;;  %1553 = vmatprep.mubr.f32.mxu0 %v263_v10 }
  0xab   :  { %1772 = vmatprep.subr.bf16.mxu0 %v1771_v11 }
  0xad   :  { %1554 = vmatmul.mubr.f32.gmra.mrb[4].mxu0 %v273_v12 }
  0xae   :  { %1774 = vmatpush3.bf16.msra.mxu0 %v1771_v11  ;;  %1568 = vmatprep.mubr.f32.mxu0 %v2032_v17 }
  0xaf   :  { %1776 = vmatprep.subr.bf16.mxu0 %v1775_v13 }
  0xb1   :  { %1569 = vmatmul.mubr.f32.vlgmr.msra.gmra.mrb[0].mxu0 %v2055_v46 }
  0xb2   :  { %1778 = vmatpush3.bf16.msra.mxu0 %v1775_v13  ;;  %1571 = vmatprep.mubr.f32.mxu0 %v2067_v54 }
  0xb3   :  { %1780 = vmatprep.subr.bf16.mxu0 %v1779_v23 }
  0xb5   :  { %1572 = vmatmul.mubr.f32.gmra.mrb[2].mxu0 %v2079_v63 }
  0xb6   :  { %1782 = vmatpush3.bf16.msra.mxu0 %v1779_v23  ;;  %1574 = vmatprep.mubr.f32.mxu0 %v2086_v6 }
  0xb7   :  { %1784 = vmatprep.subr.bf16.mxu0 %v1783_v24 }
  0xb9   :  { %1575 = vmatmul.mubr.f32.gmra.mrb[4].mxu0 %v2101_v16 }
  0xba   :  { %1786 = vmatpush3.bf16.msra.mxu0 %v1783_v24  ;;  %1589 = vmatprep.mubr.f32.mxu0 %v2035_v18  ;;  %v1807_v18 = vpack.c.bf16 %v317_v48, %v310_v51 }
  0xbb   :  { %1788 = vmatprep.subr.bf16.mxu0 %v2061_v49 }
  0xbd   :  { %1590 = vmatmul.mubr.f32.vlgmr.msra.gmra.mrb[0].mxu0 %v2077_v62 }
  0xbe   :  { %1790 = vmatpush3.bf16.msra.mxu0 %v2061_v49  ;;  %1592 = vmatprep.mubr.f32.mxu0 %v2084_v5 }
  0xbf   :  { %1792 = vmatprep.subr.bf16.mxu0 %v2090_v8 }
  0xc1   :  { %1593 = vmatmul.mubr.f32.gmra.mrb[2].mxu0 %v2099_v15 }
  0xc2   :  { %1794 = vmatpush3.bf16.msra.mxu0 %v2090_v8  ;;  %1595 = vmatprep.mubr.f32.mxu0 %v2112_v26 }
  0xc3   :  { %1796 = vmatprep.subr.bf16.mxu0 %v2133_v41 }
  0xc5   :  { %1596 = vmatmul.mubr.f32.gmra.mrb[4].mxu0 %v2119_v32 }
  0xc6   :  { %1798 = vmatpush3.bf16.msra.mxu0 %v2133_v41  ;;  %1610 = vmatprep.mubr.f32.mxu0 %v221_v19  ;;  %v1950_v19 = vmov 0.0|0.0  }
  0xc7   :  { %1800 = vmatprep.subr.bf16.mxu0 %v1799_v22  ;;  %1823 = vmatprep.subr.bf16.mxu1 %v1950_v19 }
  0xc9   :  { %1611 = vmatmul.mubr.f32.vlgmr.msra.gmra.mrb[0].mxu0 %v231_v14 }
  0xca   :  { %1802 = vmatpush3.bf16.msra.mxu0 %v1799_v22  ;;  %1613 = vmatprep.mubr.f32.mxu0 %v241_v25 }
  0xcb   :  { %1804 = vmatprep.subr.bf16.mxu0 %v1803_v27 }
  0xcd   :  { %1614 = vmatmul.mubr.f32.gmra.mrb[2].mxu0 %v251_v31 }
  0xce   :  { %1806 = vmatpush3.bf16.msra.mxu0 %v1803_v27  ;;  %1616 = vmatprep.mubr.f32.mxu0 %v261_v39 }
  0xcf   :  { %1808 = vmatprep.subr.bf16.mxu0 %v1807_v18 }
  0xd1   :  { %1617 = vmatmul.mubr.f32.gmra.mrb[4].mxu0 %v271_v47 }
  0xd2   :  { %1810 = vmatpush3.bf16.msra.mxu0 %v1807_v18  ;;  %1631 = vmatprep.mubr.f32.mxu0 %v2032_v17  ;;  %v887_v18 = vlaneseq }
  0xd3   :  { %1812 = vmatprep.subr.bf16.mxu0 %v2061_v49 }
  0xd5   :  { %1632 = vmatmul.mubr.f32.vlgmr.msra.gmra.mrb[0].mxu0 %v2055_v46 }
  0xd6   :  { %1814 = vmatpush3.bf16.msra.mxu0 %v2061_v49  ;;  %1634 = vmatprep.mubr.f32.mxu0 %v2067_v54  ;;  %v1952_v49 = vmov 0.0  }
  0xd7   :  { %1816 = vmatprep.subr.bf16.mxu0 %v2090_v8  ;;  %1673 = vmatprep.mubr.msk.f32.mxu1 %vm1951_vm1, %v1952_v49 }
  0xd9   :  { %1635 = vmatmul.mubr.f32.gmra.mrb[2].mxu0 %v2079_v63 }
  0xda   :  { %1818 = vmatpush3.bf16.msra.mxu0 %v2090_v8  ;;  %1637 = vmatprep.mubr.f32.mxu0 %v2086_v6 }
  0xdb   :  { %1820 = vmatprep.subr.bf16.mxu0 %v2133_v41 }
  0xdd   :  { %1638 = vmatmul.mubr.f32.gmra.mrb[4].mxu0 %v2101_v16 }
  0xde   :  { %1822 = vmatpush3.bf16.msra.mxu0 %v2133_v41  ;;  %1652 = vmatprep.mubr.f32.mxu0 %v2032_v17  ;;  %v880_v17 = vld [vmem:[%s2303_s4] sm:$0x1]  ;;  %s1953_s4 = smov [#allocation3]  }
  0xdf   :  { %s1412_s9 = sshll.u32 %s1953_s4, 4  ;;  %s1413_s9 = int_to_ptr.vmem [resolvable:$true] %s1412_s9 }
  0xe0   :  { %s1925_s10 = scalar_lea.vmem %s1413_s9, 16  ;;  %s1929_s11 = scalar_lea.vmem %s1413_s9, 32 }
  0xe1   :  { %1653 = vmatmul.mubr.f32.vlgmr.msra.gmra.mrb[0].mxu0 %v2055_v46  ;;  %v892_v46 = vsel %vm129_vm0, %v880_v17, 0  ;;  %v888_v17 = vshrl.u32 %v887_v18, 7  ;;  %p1926_p0 = scmp.ne.s32.totalorder %s1413_s9, %s1925_s10  ;;  %p1930_p1 = scmp.lt.s32.totalorder %s1413_s9, %s1413_s9 }
  0xe2   :  { %1655 = vmatprep.mubr.f32.mxu0 %v2067_v54  ;;  %v2230_v50 = vand.u32 4294901760, %v892_v46  ;;  %p1931_p2 = scmp.lt.s32.totalorder %s1929_s11, %s1925_s10 }
  0xe4   :  { %v2233_v62 = vsub.f32 %v892_v46, %v2230_v50  ;;  %v889_v46 = vsub.s32 0, %v888_v17  ;;  %p1932_p3 = por %p1931_p2, %p1930_p1 }
  0xe5   :  { %1656 = vmatmul.mubr.f32.gmra.mrb[2].mxu0 %v2079_v63 }
  0xe6   :  { %1658 = vmatprep.mubr.f32.mxu0 %v2086_v6  ;;  %v967_v14 = vand.u32 4294901760, %v2233_v62  ;;  %p1933_p4 = pnand %p1932_p3, %p1926_p0 }
  0xe8   :  { %v968_v35 = vsub.f32 %v2233_v62, %v967_v14 }
  0xe9   :  { %1659 = vmatmul.mubr.f32.gmra.mrb[4].mxu0 %v2101_v16 }
  0xea   :  { %v969_v0 = vand.u32 4294901760, %v968_v35 }
 0x1b4   :  { %v1654_v53 = vpop.f32.mrb[0].mxu0 }
 0x1b5   :  { %v875_v54 = vmax.f32 %v1654_v53, 0.0  ;;  %v840_v61 = vpop.f32.mrb[1].mxu0  ;;  %v885_v53 = vpop.permute.xlu0 %884 }
 0x1b6   :  { %v874_v63 = vmax.f32 %v840_v61, 0.0 }
 0x1b7   :  { %v898_v4 = vand.u32 4294901760, %v875_v54 }
 0x1b8   :  { %v895_v5 = vand.u32 4294901760, %v874_v63  ;;  %v1657_v6 = vpop.f32.mrb[2].mxu0 }
 0x1b9   :  { %v2235_v7 = vsub.f32 %v875_v54, %v898_v4  ;;  %v877_v8 = vmax.f32 %v1657_v6, 0.0  ;;  %v852_v9 = vpop.f32.mrb[3].mxu0  ;;  %v890_v54 = vrot.slane %v885_v53, %v889_v46 }
 0x1ba   :  { %v977_v15 = vsub.f32 %v874_v63, %v895_v5  ;;  %v876_v16 = vmax.f32 %v852_v9, 0.0  ;;  %v2238_v20 = vpack.c.bf16 %v898_v4, %v895_v5 }
 0x1bb   :  { %v985_v21 = vand.u32 4294901760, %v2235_v7  ;;  %v904_v25 = vand.u32 4294901760, %v877_v8 }
 0x1bc   :  { %v978_v26 = vand.u32 4294901760, %v977_v15  ;;  %v1842_v28 = vpack.c.bf16 %v2235_v7, %v977_v15  ;;  %v901_v29 = vand.u32 4294901760, %v876_v16  ;;  %v1660_v30 = vpop.f32.mrb[4].mxu0  ;;  %1825 = vmatpush3.bf16.msra.mxu1 %v2238_v20 }
 0x1bd   :  { %v986_v31 = vsub.f32 %v2235_v7, %v985_v21  ;;  %v998_v32 = vsub.f32 %v877_v8, %v904_v25  ;;  %v879_v33 = vmax.f32 %v1660_v30, 0.0  ;;  %v864_v34 = vpop.f32.mrb[5].mxu0  ;;  %1826 = vmatprep.subr.bf16.mxu1 %v1950_v19 }
 0x1be   :  { %v979_v36 = vsub.f32 %v977_v15, %v978_v26  ;;  %v991_v37 = vsub.f32 %v876_v16, %v901_v29  ;;  %v878_v38 = vmax.f32 %v864_v34, 0.0  ;;  %v2248_v39 = vpack.c.bf16 %v904_v25, %v901_v29 }
 0x1bf   :  { %v987_v40 = vand.u32 4294901760, %v986_v31  ;;  %v999_v41 = vand.u32 4294901760, %v998_v32  ;;  %v910_v42 = vand.u32 4294901760, %v879_v33  ;;  %v1860_v43 = vpack.c.bf16 %v985_v21, %v978_v26 }
 0x1c0   :  { %v980_v44 = vand.u32 4294901760, %v979_v36  ;;  %v992_v45 = vand.u32 4294901760, %v991_v37  ;;  %v1845_v47 = vpack.c.bf16 %v998_v32, %v991_v37  ;;  %v907_v48 = vand.u32 4294901760, %v878_v38  ;;  %1828 = vmatpush3.bf16.msra.mxu1 %v2248_v39 }
 0x1c1   :  { %v1000_v51 = vsub.f32 %v998_v32, %v999_v41  ;;  %v1012_v52 = vsub.f32 %v879_v33, %v910_v42  ;;  %1829 = vmatprep.subr.bf16.mxu1 %v1950_v19 }
 0x1c2   :  { %v993_v55 = vsub.f32 %v991_v37, %v992_v45  ;;  %v1830_v56 = vpack.c.bf16 %v910_v42, %v907_v48  ;;  %v1005_v57 = vsub.f32 %v878_v38, %v907_v48  ;;  %v1833_v58 = vpack.c.bf16 %v987_v40, %v980_v44 }
 0x1c3   :  { %v1001_v59 = vand.u32 4294901760, %v1000_v51  ;;  %v1013_v60 = vand.u32 4294901760, %v1012_v52  ;;  %v1863_v1 = vpack.c.bf16 %v999_v41, %v992_v45 }
 0x1c4   :  { %v994_v2 = vand.u32 4294901760, %v993_v55  ;;  %v1006_v3 = vand.u32 4294901760, %v1005_v57  ;;  %v1848_v10 = vpack.c.bf16 %v1012_v52, %v1005_v57  ;;  %1831 = vmatpush3.bf16.msra.mxu1 %v1830_v56 }
 0x1c5   :  { %v1014_v11 = vsub.f32 %v1012_v52, %v1013_v60  ;;  %1832 = vmatprep.subr.bf16.mxu1 %v1950_v19 }
 0x1c6   :  { %v1007_v12 = vsub.f32 %v1005_v57, %v1006_v3  ;;  %v1836_v13 = vpack.c.bf16 %v1001_v59, %v994_v2  ;;  %v1866_v23 = vpack.c.bf16 %v1013_v60, %v1006_v3 }
 0x1c7   :  { %v1015_v24 = vand.u32 4294901760, %v1014_v11  ;;  %1674 = vmatmul.mubr.f32.vlgmr.msra.gmra.mrb[0].mxu1 %v969_v0 }
 0x1c8   :  { %v1008_v22 = vand.u32 4294901760, %v1007_v12  ;;  %1834 = vmatpush3.bf16.msra.mxu1 %v1833_v58  ;;  %1688 = vmatprep.mubr.msk.f32.mxu1 %vm1951_vm1, %v1952_v49 }
 0x1c9   :  { %1835 = vmatprep.subr.bf16.mxu1 %v1950_v19 }
 0x1ca   :  { %v1839_v27 = vpack.c.bf16 %v1015_v24, %v1008_v22 }
 0x1cc   :  { %1837 = vmatpush3.bf16.msra.mxu1 %v1836_v13 }
 0x1cd   :  { %1838 = vmatprep.subr.bf16.mxu1 %v1950_v19 }
 0x1d0   :  { %1840 = vmatpush3.bf16.msra.mxu1 %v1839_v27 }
 0x1d1   :  { %1841 = vmatprep.subr.bf16.mxu1 %v1950_v19 }
 0x1d3   :  { %1689 = vmatmul.mubr.f32.vlgmr.msra.gmra.mrb[0].mxu1 %v2230_v50 }
 0x1d4   :  { %1843 = vmatpush3.bf16.msra.mxu1 %v1842_v28  ;;  %1703 = vmatprep.mubr.msk.f32.mxu1 %vm1951_vm1, %v1952_v49 }
 0x1d5   :  { %1844 = vmatprep.subr.bf16.mxu1 %v1950_v19 }
 0x1d8   :  { %1846 = vmatpush3.bf16.msra.mxu1 %v1845_v47 }
 0x1d9   :  { %1847 = vmatprep.subr.bf16.mxu1 %v1950_v19 }
 0x1dc   :  { %1849 = vmatpush3.bf16.msra.mxu1 %v1848_v10 }
 0x1dd   :  { %1850 = vmatprep.subr.bf16.mxu1 %v1950_v19 }
 0x1df   :  { %1704 = vmatmul.mubr.f32.vlgmr.msra.gmra.mrb[0].mxu1 %v2233_v62 }
 0x1e0   :  { %1852 = vmatpush3.bf16.msra.mxu1 %v2238_v20  ;;  %1718 = vmatprep.mubr.msk.f32.mxu1 %vm1951_vm1, %v1952_v49 }
 0x1e1   :  { %1853 = vmatprep.subr.bf16.mxu1 %v1950_v19 }
 0x1e4   :  { %1855 = vmatpush3.bf16.msra.mxu1 %v2248_v39 }
 0x1e5   :  { %1856 = vmatprep.subr.bf16.mxu1 %v1950_v19 }
 0x1e8   :  { %1858 = vmatpush3.bf16.msra.mxu1 %v1830_v56 }
 0x1e9   :  { %1859 = vmatprep.subr.bf16.mxu1 %v1950_v19 }
 0x1eb   :  { %1719 = vmatmul.mubr.f32.vlgmr.msra.gmra.mrb[0].mxu1 %v967_v14 }
 0x1ec   :  { %1861 = vmatpush3.bf16.msra.mxu1 %v1860_v43  ;;  %1733 = vmatprep.mubr.msk.f32.mxu1 %vm1951_vm1, %v1952_v49 }
 0x1ed   :  { %1862 = vmatprep.subr.bf16.mxu1 %v1950_v19 }
 0x1f0   :  { %1864 = vmatpush3.bf16.msra.mxu1 %v1863_v1 }
 0x1f1   :  { %1865 = vmatprep.subr.bf16.mxu1 %v1950_v19 }
 0x1f4   :  { %1867 = vmatpush3.bf16.msra.mxu1 %v1866_v23 }
 0x1f5   :  { %1868 = vmatprep.subr.bf16.mxu1 %v1950_v19 }
 0x1f7   :  { %1734 = vmatmul.mubr.f32.vlgmr.msra.gmra.mrb[0].mxu1 %v2230_v50 }
 0x1f8   :  { %1870 = vmatpush3.bf16.msra.mxu1 %v2238_v20  ;;  %1748 = vmatprep.mubr.msk.f32.mxu1 %vm1951_vm1, %v1952_v49 }
 0x1f9   :  { %1871 = vmatprep.subr.bf16.mxu1 %v1950_v19 }
 0x1fc   :  { %1873 = vmatpush3.bf16.msra.mxu1 %v2248_v39 }
 0x1fd   :  { %1874 = vmatprep.subr.bf16.mxu1 %v1950_v19 }
 0x200   :  { %1876 = vmatpush3.bf16.msra.mxu1 %v1830_v56 }
 0x203   :  { %1749 = vmatmul.mubr.f32.vlgmr.msra.gmra.mrb[0].mxu1 %v2230_v50 }
 0x2d6   :  { %v1401_v61 = vpop.f32.mrb[0].mxu1 }
 0x2d7   :  { %v1877_v62 = vadd.f32 %v1401_v61, %v890_v54  ;;  %v1750_v63 = vpop.f32.mrb[1].mxu1 }
 0x2d9   :  { %1405 = vst [vmem:[#allocation3] sm:$0x1] %v1877_v62 }
 0x2da   :  { %1936 = shalt.err (!%p1933_p4)
}
 0x2db   :  { %s1937_s14 = scalar_lea.hbm %s2305_s6, 16 }
 0x2dc   :  { %p1938_p5 = scmp.ne.s32.totalorder %s2305_s6, %s1937_s14  ;;  %p1941_p6 = scmp.lt.u32.totalorder %s1937_s14, %s2305_s6 }
 0x2de   :  { %p1943_p7 = pnand %p1941_p6, %p1938_p5 }
 0x2e0   :  { %1946 = shalt.err (!%p1943_p7)
}
 0x2e1   :  { %1415 = dma.vmem_to_hbm [thread:$0]  %s1413_s9, 16, %s2305_s6, [#allocation4]  }
 0x2e2   :  { %1947 = dma.done.wait [#allocation4], 16  }
 0x2e3   :  { %1948 = vsyncadd [#allocation4], 4294967280 }
 0x2e4   :  { %1419 = vsyncpa [#allocation4], 1 }

</bundles_post_ra>
